<compile_context>
chip_gen: v6e
topology: v6e:2x2x1
jax: 0.10.0
libtpu: 0.0.40
codegen_flags: <defaults>
</compile_context>

<pallas_src>
import jax
import jax.numpy as jnp
from jax.experimental import pallas as pl
from jax.experimental.pallas import tpu as pltpu


# ---------------------------------------------------------------------------
# Kernels
# ---------------------------------------------------------------------------

def _rowtile_kernel(x_ref, h_ref, o_ref):
    # (TM, K) @ (K, K) on the MXU; H stays VMEM-resident across the row grid.
    o_ref[...] = jnp.dot(
        x_ref[...], h_ref[...], preferred_element_type=jnp.float32
    ).astype(o_ref.dtype)


def _blocked_matmul_kernel(x_ref, h_ref, o_ref, acc_ref):
    # Large-D path: K-reduction grid axis + f32 accumulator (standard P3).
    @pl.when(pl.program_id(2) == 0)
    def _():
        acc_ref[...] = jnp.zeros_like(acc_ref)

    acc_ref[...] += jnp.dot(
        x_ref[...], h_ref[...], preferred_element_type=jnp.float32
    )

    @pl.when(pl.program_id(2) == pl.num_programs(2) - 1)
    def _():
        o_ref[...] = acc_ref[...].astype(o_ref.dtype)


# ---------------------------------------------------------------------------
# Helpers
# ---------------------------------------------------------------------------

def _round_up(x: int, m: int) -> int:
    return ((x + m - 1) // m) * m


def _round_down(x: int, m: int) -> int:
    return max(m, (x // m) * m)


def _pick_tile(dim: int) -> int:
    # dim is a multiple of 128; pick the largest tile that divides it.
    for t in (512, 256, 128):
        if dim % t == 0:
            return t
    return 128


def _rowtile_matmul(x, h, out_dtype, tile_rows):
    """x: (M, K), h: (K, K), K <= 512 and a multiple of 128."""
    m, k = x.shape
    itemsize = x.dtype.itemsize

    # ~4 MiB per input block: 2 in-bufs + 2 out-bufs + H stays well under
    # 32 MiB of scoped VMEM, which is safe on every generation incl. v7x.
    budget_rows = _round_down((4 << 20) // (k * itemsize), 8)
    tm = min(_round_down(tile_rows, 8), budget_rows)

    if m <= tm:
        if m > 4096:
            # Guarantee >= 2 grid steps so ("parallel",) can shard the rows
            # across both v7x TensorCores. Neutral on v5e/v6e.
            tm = _round_up(pl.cdiv(m, 2), 8)
        else:
            tm = m  # single full-array block (no 8-divisibility requirement)

    mp = _round_up(m, tm)
    if mp != m:
        x = jnp.pad(x, ((0, mp - m), (0, 0)))
    grid = (mp // tm,)

    # 2 in-bufs + 2 out-bufs + 2 H bufs (+50% headroom), capped v7x-safe.
    footprint = 4 * tm * k * itemsize + 2 * k * k * h.dtype.itemsize
    vmem_limit = int(min(max(footprint * 3 // 2, 16 << 20), 32 << 20))

    out = pl.pallas_call(
        _rowtile_kernel,
        out_shape=jax.ShapeDtypeStruct((mp, k), out_dtype),
        grid=grid,
        in_specs=[
            pl.BlockSpec((tm, k), lambda i: (i, 0)),   # row tiles, pipelined
            pl.BlockSpec((k, k), lambda i: (0, 0)),    # H resident across grid
        ],
        out_specs=pl.BlockSpec((tm, k), lambda i: (i, 0)),
        compiler_params=pltpu.CompilerParams(
            dimension_semantics=("parallel",),
            vmem_limit_bytes=vmem_limit,
        ),
    )(x, h)
    return out[:m] if mp != m else out


def _blocked_matmul(x, h, out_dtype):
    """x: (M, K), h: (K, K), K > 512 and a multiple of 128."""
    m, k = x.shape
    tm = min(512, _round_up(m, 8))
    tn = _pick_tile(k)
    tk = _pick_tile(k)

    mp = _round_up(m, tm)
    if mp != m:
        x = jnp.pad(x, ((0, mp - m), (0, 0)))
    grid = (mp // tm, k // tn, k // tk)

    out = pl.pallas_call(
        _blocked_matmul_kernel,
        out_shape=jax.ShapeDtypeStruct((mp, k), out_dtype),
        grid=grid,
        in_specs=[
            pl.BlockSpec((tm, tk), lambda i, j, kk: (i, kk)),
            pl.BlockSpec((tk, tn), lambda i, j, kk: (kk, j)),
        ],
        out_specs=pl.BlockSpec((tm, tn), lambda i, j, kk: (i, j)),
        scratch_shapes=[pltpu.VMEM((tm, tn), jnp.float32)],
        compiler_params=pltpu.CompilerParams(
            dimension_semantics=("parallel", "parallel", "arbitrary"),
            vmem_limit_bytes=32 * 1024 * 1024,
        ),
    )(x, h)
    return out[:m] if mp != m else out


# ---------------------------------------------------------------------------
# Public wrapper
# ---------------------------------------------------------------------------

def schrodinger_operator(
    fields: jax.Array,
    h_real: jax.Array,
    h_imag: jax.Array,
    *,
    tile_rows: int = 8192,
    xla_fallback_rows: int = 1024,
    io_dtype=None,
) -> jax.Array:
    """fields: (B, N, D); h_real/h_imag: (D, D) -> (B, N, D).

    tile_rows:          row-tile cap for the K<=512 path (packed, 128 lanes).
    xla_fallback_rows:  below ~this many packed rows, use plain XLA einsum
                        (kernel-launch overhead dominates). 0 disables bypass.
    io_dtype:           opt-in narrower I/O dtype (e.g. jnp.bfloat16) for the
                        HBM-bound path; MXU still accumulates in f32.
    """
    b, n, d = fields.shape

    # H_real participates in the PyTorch forward but never reaches the
    # returned tensor, so it is not materialized here.
    del h_real

    # Anti-symmetrize once in the wrapper (D x D prep, negligible in XLA).
    h_anti = (h_imag - h_imag.T) * 0.5

    rows = b * n

    # Small-problem bypass: fixed pallas_call overhead dominates for tiny B*N.
    if xla_fallback_rows > 0 and rows * max(d, 1) < xla_fallback_rows * 128:
        return jnp.einsum("bnd,de->bne", fields, h_anti)

    x2 = fields.reshape(rows, d)
    out_dtype = fields.dtype
    if io_dtype is not None:
        x2 = x2.astype(io_dtype)
        h_anti = h_anti.astype(io_dtype)
        out_dtype = io_dtype

    if d <= 128:
        # Lane-dense packing: pad D up to a power-of-two divisor of 128, fold
        # f = 128/dp consecutive tokens into one 128-lane row, and use a
        # block-diagonal Hamiltonian. All stores are full-lane vst.
        dp = 1
        while dp < d:
            dp *= 2
        if dp != d:
            x2 = jnp.pad(x2, ((0, 0), (0, dp - d)))
            h_anti = jnp.pad(h_anti, ((0, dp - d), (0, dp - d)))
        f = 128 // dp
        rpad = (-rows) % f
        if rpad:
            x2 = jnp.pad(x2, ((0, rpad), (0, 0)))
        packed_m = (rows + rpad) // f
        x_packed = x2.reshape(packed_m, 128)
        h_mat = jnp.kron(jnp.eye(f, dtype=h_anti.dtype), h_anti)
        k = 128
    else:
        # Large D: pad up to a multiple of 128 so every block is lane-aligned.
        dp = _round_up(d, 128)
        if dp != d:
            x2 = jnp.pad(x2, ((0, 0), (0, dp - d)))
            h_anti = jnp.pad(h_anti, ((0, dp - d), (0, dp - d)))
        f = 1
        packed_m = rows
        x_packed = x2
        h_mat = h_anti
        k = dp

    if k <= 512:
        out_packed = _rowtile_matmul(x_packed, h_mat, out_dtype, tile_rows)
    else:
        out_packed = _blocked_matmul(x_packed, h_mat, out_dtype)

    out2 = out_packed.reshape(packed_m * f, dp)[:rows, :d]
    return out2.reshape(b, n, d).astype(fields.dtype)


def _reference(fields, h_real, h_imag):
    h_imag_anti = (h_imag - h_imag.T) / 2.0
    return jnp.einsum("bnd,de->bne", fields, h_imag_anti)


if __name__ == "__main__":
    key = jax.random.PRNGKey(0)
    k_fields, k_himag, k_f2, k_h2 = jax.random.split(key, 4)

    # Shapes consistent with the module's forward: (batch, num_tokens, embed_dim)
    batch, num_tokens, embed_dim = 2, 8, 32
    fields = jax.random.normal(
        k_fields, (batch, num_tokens, embed_dim), dtype=jnp.float32
    )
    # Module __init__ uses eye / zeros; zeros would make the output trivially
    # zero, so hamiltonian_imag is perturbed deterministically.
    hamiltonian_real = jnp.eye(embed_dim, dtype=jnp.float32)
    hamiltonian_imag = 0.02 * jax.random.normal(
        k_himag, (embed_dim, embed_dim), dtype=jnp.float32
    )

    # Force the Pallas path (xla_fallback_rows=0) so the kernel actually runs
    # at this demo size; production callers keep the default bypass.
    out = schrodinger_operator(
        fields, hamiltonian_real, hamiltonian_imag, xla_fallback_rows=0
    )
    out = jax.block_until_ready(out)
    ref = _reference(fields, hamiltonian_real, hamiltonian_imag)
    assert out.shape == (batch, num_tokens, embed_dim)
    assert jnp.allclose(out, ref, atol=1e-5, rtol=1e-5), "mismatch vs reference"

    # Extra check: non-divisor embed dim exercises the D- and row-padding path.
    b2, n2, d2 = 2, 10, 48
    fields2 = jax.random.normal(k_f2, (b2, n2, d2), dtype=jnp.float32)
    h_imag2 = 0.02 * jax.random.normal(k_h2, (d2, d2), dtype=jnp.float32)
    out2 = schrodinger_operator(
        fields2, jnp.eye(d2, dtype=jnp.float32), h_imag2, xla_fallback_rows=0
    )
    out2 = jax.block_until_ready(out2)
    ref2 = _reference(fields2, jnp.eye(d2, dtype=jnp.float32), h_imag2)
    assert jnp.allclose(out2, ref2, atol=1e-5, rtol=1e-5), "mismatch (padded path)"

    print("KERNEL_OK")
</pallas_src>

<mosaic_0001>
module attributes {stable_mosaic.version = 11 : i64} {
  func.func @_rowtile_kernel(%arg0: i32, %arg1: memref<4x128xf32, #tpu.memory_space<vmem>>, %arg2: memref<128x128xf32, #tpu.memory_space<vmem>>, %arg3: memref<4x128xf32, #tpu.memory_space<vmem>>) attributes {dimension_semantics = [#tpu.dimension_semantics<parallel>], iteration_bounds = array<i64: 1>, scalar_prefetch = 0 : i64, scratch_operands = 0 : i64, tpu.core_type = #tpu.core_type<tc>, window_params = [{transform_indices = @transform_0, window_bounds = array<i64: 4, 128>}, {pipeline_mode = #tpu.pipeline_mode<synchronous>, transform_indices = @transform_1, window_bounds = array<i64: 128, 128>}, {transform_indices = @transform_2, window_bounds = array<i64: 4, 128>}]} {
    %c0 = arith.constant 0 : index
    %c0_0 = arith.constant 0 : index
    %0 = vector.load %arg1[%c0, %c0_0] : memref<4x128xf32, #tpu.memory_space<vmem>>, vector<4x128xf32>
    %c0_1 = arith.constant 0 : index
    %c0_2 = arith.constant 0 : index
    %1 = vector.load %arg2[%c0_1, %c0_2] : memref<128x128xf32, #tpu.memory_space<vmem>>, vector<128x128xf32>
    %cst = arith.constant dense<0.000000e+00> : vector<4x128xf32>
    %2 = tpu.matmul %0, %1, %cst {dimension_numbers = #tpu.dot_dimension_numbers<[1], [0], [0], [1], [0, 0, 1, 1], [], []>} : vector<4x128xf32>, vector<128x128xf32>, vector<4x128xf32> -> vector<4x128xf32>
    %c0_3 = arith.constant 0 : index
    %c0_4 = arith.constant 0 : index
    %3 = vector.load %arg3[%c0_3, %c0_4] : memref<4x128xf32, #tpu.memory_space<vmem>>, vector<4x128xf32>
    tpu.vector_store %arg3[%c0_3, %c0_4], %2 {strides = array<i32>} : memref<4x128xf32, #tpu.memory_space<vmem>>, vector<4x128xf32>,
    return
  }
  func.func @transform_0(%arg0: i32) -> (i32, i32) {
    %c0_i32 = arith.constant 0 : i32
    %c0_i32_0 = arith.constant 0 : i32
    return %arg0, %c0_i32 : i32, i32
  }
  func.func @transform_1(%arg0: i32) -> (i32, i32) {
    %c0_i32 = arith.constant 0 : i32
    %c0_i32_0 = arith.constant 0 : i32
    %c0_i32_1 = arith.constant 0 : i32
    return %c0_i32, %c0_i32_0 : i32, i32
  }
  func.func @transform_2(%arg0: i32) -> (i32, i32) {
    %c0_i32 = arith.constant 0 : i32
    %c0_i32_0 = arith.constant 0 : i32
    return %arg0, %c0_i32 : i32, i32
  }
}

</mosaic_0001>

<bundles_post_ra>
// kernel: tpu_custom_call.1
= control target key start
LH: loop header
LB: loop body
LE: loop exit
PB: predicated region body
PF: predicated region fallthrough
CT: control target
= control target key end

     0   :  { %7 = vsyncpa [#allocation3], 0  ;;  %s298_s0 = inlined_call_operand.hbm [shape: f32[4,128], index: 0, kind: input, shape index: {}]   ;;  %s299_s1 = inlined_call_operand.hbm [shape: f32[128,128], index: 1, kind: input, shape index: {}]   ;;  %s300_s2 = inlined_call_operand.hbm [shape: f32[4,128], index: 2, kind: output, shape index: {}]  }
   0x1   :  { %8 = vsyncpa [#allocation6], 0 }
   0x2   :  { %9 = vsyncpa [#allocation4], 0  ;;  %s267_s9 = smov [#allocation2]   ;;  %s268_s11 = smov [#allocation5]  }
   0x3   :  { %s16_s10 = sshll.u32 %s267_s9, 4  ;;  %s25_s12 = sshll.u32 %s268_s11, 4  ;;  %s17_s10 = int_to_ptr.vmem [resolvable:$true] %s16_s10  ;;  %s26_s12 = int_to_ptr.vmem [resolvable:$true] %s25_s12 }
   0x4   :  { %s209_s13 = scalar_lea.vmem %s17_s10, 64  ;;  %p214_p1 = scmp.lt.s32.totalorder %s17_s10, %s17_s10 }
   0x5   :  { %p210_p0 = scmp.ne.s32.totalorder %s17_s10, %s209_s13  ;;  %p215_p2 = scmp.lt.s32.totalorder %s209_s13, %s209_s13 }
   0x7   :  { %p216_p3 = por %p215_p2, %p214_p1 }
   0x9   :  { %p217_p4 = pnand %p216_p3, %p210_p0 }
   0xb   :  { %220 = shalt.err (!%p217_p4)
}
   0xc   :  { %19 = dma.hbm_to_vmem [thread:$0]  %s298_s0, 64, %s17_s10, [#allocation3]  }
   0xd   :  { %s229_s16 = scalar_lea.vmem %s26_s12, 2048  ;;  %p234_p6 = scmp.lt.s32.totalorder %s26_s12, %s26_s12 }
   0xe   :  { %p230_p5 = scmp.ne.s32.totalorder %s26_s12, %s229_s16  ;;  %p235_p7 = scmp.lt.s32.totalorder %s229_s16, %s229_s16 }
  0x10   :  { %p236_p8 = por %p235_p7, %p234_p6 }
  0x12   :  { %p237_p9 = pnand %p236_p8, %p230_p5 }
  0x14   :  { %240 = shalt.err (!%p237_p9)
}
  0x15   :  { %s269_s17 = smov 128   ;;  %s270_s18 = smov 8  }
  0x16   :  { %31 = dma.hbm_to_vmem [thread:$0]  %s299_s1, 2048, %s26_s12, [#allocation6], %s269_s17, %s269_s17, %s270_s18  }
  0x17   :  { %261 = dma.done.wait [#allocation3], 64  }
  0x18   :  { %262 = vsyncadd [#allocation3], 4294967232 }
  0x19   :  { %263 = dma.done.wait [#allocation6], 2048  }
  0x1a   :  { %264 = vsyncadd [#allocation6], 4294965248  ;;  %v271_v0 = vmov 0.0   ;;  %vm272_vm0 = vmmov 0   ;;  %v54_v1 = vld [vmem:[#allocation5 + $0x78] sm:$0xff]  ;;  %v53_v2 = vld [vmem:[#allocation5 + $0x70] sm:$0xff] }
  0x1b   :  { %159 = vmatprep.subr.mxu0 %v271_v0  ;;  %191 = vmatprep.mubr.msk.f32.mxu0 %vm272_vm0, %v271_v0  ;;  %v52_v3 = vld [vmem:[#allocation5 + $0x68] sm:$0xff]  ;;  %v51_v4 = vld [vmem:[#allocation5 + $0x60] sm:$0xff]  ;;  %v50_v5 = vld [vmem:[#allocation5 + $0x58] sm:$0xff]  ;;  %s273_s0 = smov [#allocation7]  }
  0x1c   :  { %160 = vmatpush3.msra.mxu0 %v54_v1  ;;  %v49_v6 = vld [vmem:[#allocation5 + $0x50] sm:$0xff]  ;;  %v48_v7 = vld [vmem:[#allocation5 + $0x48] sm:$0xff]  ;;  %v47_v8 = vld [vmem:[#allocation5 + $0x40] sm:$0xff]  ;;  %s132_s1 = sshll.u32 %s273_s0, 4  ;;  %s133_s1 = int_to_ptr.vmem [resolvable:$true] %s132_s1 }
  0x1d   :  { %161 = vmatprep.subr.mxu0 %v271_v0  ;;  %v46_v9 = vld [vmem:[#allocation5 + $0x38] sm:$0xff]  ;;  %v45_v10 = vld [vmem:[#allocation5 + $0x30] sm:$0xff]  ;;  %v44_v11 = vld [vmem:[#allocation5 + $0x28] sm:$0xff]  ;;  %s241_s21 = scalar_lea.vmem %s133_s1, 64  ;;  %p246_p11 = scmp.lt.s32.totalorder %s133_s1, %s133_s1 }
  0x1e   :  { %162 = vmatpush3.msra.mxu0 %v53_v2  ;;  %v43_v12 = vld [vmem:[#allocation5 + $0x20] sm:$0xff]  ;;  %v42_v13 = vld [vmem:[#allocation5 + $0x18] sm:$0xff]  ;;  %v41_v14 = vld [vmem:[#allocation5 + $0x10] sm:$0xff]  ;;  %p242_p10 = scmp.ne.s32.totalorder %s133_s1, %s241_s21  ;;  %p247_p12 = scmp.lt.s32.totalorder %s241_s21, %s241_s21 }
  0x1f   :  { %163 = vmatprep.subr.mxu0 %v271_v0  ;;  %v40_v15 = vld [vmem:[#allocation5 + $0x8] sm:$0xff]  ;;  %v39_v16 = vld [vmem:[#allocation5] sm:$0xff]  ;;  %v38_v17 = vld [vmem:[#allocation2] sm:$0xf] }
  0x20   :  { %164 = vmatpush3.msra.mxu0 %v52_v3  ;;  %p248_p13 = por %p247_p12, %p246_p11 }
  0x21   :  { %165 = vmatprep.subr.mxu0 %v271_v0 }
  0x22   :  { %166 = vmatpush3.msra.mxu0 %v51_v4  ;;  %p249_p0 = pnand %p248_p13, %p242_p10 }
  0x23   :  { %167 = vmatprep.subr.mxu0 %v271_v0 }
  0x24   :  { %168 = vmatpush3.msra.mxu0 %v50_v5 }
  0x25   :  { %169 = vmatprep.subr.mxu0 %v271_v0 }
  0x26   :  { %170 = vmatpush3.msra.mxu0 %v49_v6 }
  0x27   :  { %171 = vmatprep.subr.mxu0 %v271_v0 }
  0x28   :  { %172 = vmatpush3.msra.mxu0 %v48_v7 }
  0x29   :  { %173 = vmatprep.subr.mxu0 %v271_v0 }
  0x2a   :  { %174 = vmatpush3.msra.mxu0 %v47_v8 }
  0x2b   :  { %175 = vmatprep.subr.mxu0 %v271_v0 }
  0x2c   :  { %176 = vmatpush3.msra.mxu0 %v46_v9 }
  0x2d   :  { %177 = vmatprep.subr.mxu0 %v271_v0 }
  0x2e   :  { %178 = vmatpush3.msra.mxu0 %v45_v10 }
  0x2f   :  { %179 = vmatprep.subr.mxu0 %v271_v0 }
  0x30   :  { %180 = vmatpush3.msra.mxu0 %v44_v11 }
  0x31   :  { %181 = vmatprep.subr.mxu0 %v271_v0 }
  0x32   :  { %182 = vmatpush3.msra.mxu0 %v43_v12 }
  0x33   :  { %183 = vmatprep.subr.mxu0 %v271_v0 }
  0x34   :  { %184 = vmatpush3.msra.mxu0 %v42_v13 }
  0x35   :  { %185 = vmatprep.subr.mxu0 %v271_v0 }
  0x36   :  { %186 = vmatpush3.msra.mxu0 %v41_v14 }
  0x37   :  { %187 = vmatprep.subr.mxu0 %v271_v0 }
  0x38   :  { %188 = vmatpush3.msra.mxu0 %v40_v15 }
  0x39   :  { %189 = vmatprep.subr.mxu0 %v271_v0 }
  0x3a   :  { %190 = vmatpush3.msra.mxu0 %v39_v16 }
  0x3b   :  { %192 = vmatmul.mubr.f32.vlgmr.msra.gmra.mxu0 %v38_v17 }
  0xfb   :  { %v121_v18 = vpop.f32.mrf.mxu0 }
  0xfc   :  { %125 = vst [vmem:[#allocation7] sm:$0xf] %v121_v18 }
  0xfd   :  { %v193_v19 = vpop.f32.mrf.mxu0 }
  0xfe   :  { %252 = shalt.err (!%p249_p0)
}
  0xff   :  { %135 = dma.vmem_to_hbm [thread:$0]  %s133_s1, 64, %s300_s2, [#allocation4]  }
 0x100   :  { %265 = dma.done.wait [#allocation4], 64  }
 0x101   :  { %266 = vsyncadd [#allocation4], 4294967232 }
 0x102   :  { %139 = vsyncpa [#allocation3], 1 }
 0x103   :  { %140 = vsyncpa [#allocation6], 1 }
 0x104   :  { %141 = vsyncpa [#allocation4], 1 }

</bundles_post_ra>
